<compile_context>
chip_gen: v5e
topology: v5e:2x2
jax: 0.10.0
libtpu: 0.0.40
codegen_flags: <defaults>
</compile_context>

<pallas_src>
from functools import lru_cache

import numpy as np
import jax
import jax.numpy as jnp
from jax.experimental import pallas as pl
from jax.experimental.pallas import tpu as pltpu


@lru_cache(maxsize=None)
def _interp_matrix(out_size: int, in_size: int, scale: float) -> np.ndarray:
    """Row-interpolation matrix matching PyTorch bilinear, align_corners=False."""
    o = np.arange(out_size, dtype=np.float64)
    src = (o + 0.5) / scale - 0.5
    # PyTorch clamps negative source coords to 0 (align_corners=False, non-cubic).
    src = np.clip(src, 0.0, None)
    i0 = np.floor(src)
    frac = src - i0
    i0 = i0.astype(np.int64)
    i1 = np.minimum(i0 + 1, in_size - 1)
    i0 = np.minimum(i0, in_size - 1)
    m = np.zeros((out_size, in_size), dtype=np.float64)
    rows = np.arange(out_size)
    np.add.at(m, (rows, i0), 1.0 - frac)
    np.add.at(m, (rows, i1), frac)
    return m.astype(np.float32)


def _choose_c_tile(nc: int, h: int, w: int, h_out: int, w_out: int,
                   itemsize: int) -> int:
    """Largest channel tile that keeps double-buffered blocks + intermediates
    within a conservative VMEM budget (safe on v5e/v6e/v7x)."""
    budget = 16 * 1024 * 1024
    per_c = ((2 * h * w + 2 * h_out * w_out + 2 * h_out * h) * itemsize
             + (h_out * w + h_out * w_out) * 4)          # f32 intermediates
    c_tile = max(1, budget // max(per_c, 1))
    c_tile = int(min(c_tile, nc, 128))
    if c_tile >= 8:
        c_tile -= c_tile % 8                             # keep batch dim tidy
    return max(c_tile, 1)


def _interp_kernel(x_ref, wyb_ref, wx_ref, o_ref):
    # x_ref:   (C_TILE, H, W)          tile of channels
    # wyb_ref: (C_TILE, H_out, H)      Wy broadcast over the channel tile (resident)
    # wx_ref:  (W, W_out)              column interpolation weights (resident)
    # o_ref:   (C_TILE, H_out, W_out)
    c, h, w = x_ref.shape
    h_out = wyb_ref.shape[1]
    w_out = wx_ref.shape[1]

    x = x_ref[...]                                        # (c, h, w)

    # 1) Height interpolation: batched MXU matmul, batch = channel.
    #    (c, h_out, h) @ (c, h, w) -> (c, h_out, w), accumulate in f32.
    t = jnp.einsum('coh,chw->cow', wyb_ref[...], x,
                   preferred_element_type=jnp.float32)

    # 2) Width interpolation: one large-M MXU matmul over all channels*rows.
    #    (c*h_out, w) @ (w, w_out) -> (c*h_out, w_out); result is already in
    #    the output layout (just an un-collapse of the leading dims).
    t2 = t.reshape(c * h_out, w).astype(x.dtype)
    out = jnp.dot(t2, wx_ref[...], preferred_element_type=jnp.float32)

    o_ref[...] = out.reshape(c, h_out, w_out).astype(o_ref.dtype)


def interpolate_bilinear(x: jnp.ndarray, scale_factor: float = 2) -> jnp.ndarray:
    """Equivalent of F.interpolate(x, scale_factor=2, mode='bilinear',
    align_corners=False) for NCHW input."""
    n, c, h, w = x.shape
    h_out = int(round(h * scale_factor))
    w_out = int(round(w * scale_factor))
    nc = n * c

    itemsize = jnp.dtype(x.dtype).itemsize
    c_tile = _choose_c_tile(nc, h, w, h_out, w_out, itemsize)

    wy = _interp_matrix(h_out, h, float(scale_factor))        # (H_out, H)
    wx = _interp_matrix(w_out, w, float(scale_factor)).T      # (W, W_out)

    # Weights in x.dtype (exact for scale_factor=2); bf16 inputs -> full MXU rate.
    wyb = jnp.broadcast_to(jnp.asarray(wy, dtype=x.dtype), (c_tile, h_out, h))
    wx_j = jnp.asarray(wx, dtype=x.dtype)

    x_flat = x.reshape(nc, h, w)
    grid = (pl.cdiv(nc, c_tile),)

    out_flat = pl.pallas_call(
        _interp_kernel,
        out_shape=jax.ShapeDtypeStruct((nc, h_out, w_out), x.dtype),
        grid_spec=pltpu.PrefetchScalarGridSpec(
            num_scalar_prefetch=0,
            grid=grid,
            in_specs=[
                pl.BlockSpec((c_tile, h, w), lambda i: (i, 0, 0)),
                pl.BlockSpec((c_tile, h_out, h), lambda i: (0, 0, 0)),   # resident
                pl.BlockSpec((w, w_out), lambda i: (0, 0)),              # resident
            ],
            out_specs=pl.BlockSpec((c_tile, h_out, w_out), lambda i: (i, 0, 0)),
        ),
        compiler_params=pltpu.CompilerParams(
            dimension_semantics=("parallel",),
            vmem_limit_bytes=32 * 1024 * 1024,
        ),
    )(x_flat, wyb, wx_j)

    return out_flat.reshape(n, c, h_out, w_out)


if __name__ == "__main__":
    key = jax.random.PRNGKey(0)
    x = jax.random.normal(key, (2, 4, 16, 16), dtype=jnp.float32)

    out = interpolate_bilinear(x, scale_factor=2)
    out = jax.block_until_ready(out)
    assert out.shape == (2, 4, 32, 32), out.shape

    # Exact float64 numpy reference using the same separable formulation.
    wy64 = _interp_matrix(32, 16, 2.0).astype(np.float64)
    wx64 = _interp_matrix(32, 16, 2.0).astype(np.float64)
    ref = np.einsum('oh,nchw,pw->ncop', wy64, np.asarray(x, np.float64), wx64)
    # Tolerance covers worst-case bf16-pass MXU rounding of f32 matmuls.
    np.testing.assert_allclose(np.asarray(out, np.float64), ref,
                               rtol=2e-2, atol=2e-2)

    print("KERNEL_OK")
</pallas_src>

<mosaic_0001>
module attributes {stable_mosaic.version = 11 : i64} {
  func.func @_interp_kernel(%arg0: i32, %arg1: memref<8x16x16xf32, #tpu.memory_space<vmem>>, %arg2: memref<8x32x16xf32, #tpu.memory_space<vmem>>, %arg3: memref<16x32xf32, #tpu.memory_space<vmem>>, %arg4: memref<8x32x32xf32, #tpu.memory_space<vmem>>) attributes {dimension_semantics = [#tpu.dimension_semantics<parallel>], iteration_bounds = array<i64: 1>, scalar_prefetch = 0 : i64, scratch_operands = 0 : i64, tpu.core_type = #tpu.core_type<tc>, window_params = [{transform_indices = @transform_0, window_bounds = array<i64: 8, 16, 16>}, {pipeline_mode = #tpu.pipeline_mode<synchronous>, transform_indices = @transform_1, window_bounds = array<i64: 8, 32, 16>}, {pipeline_mode = #tpu.pipeline_mode<synchronous>, transform_indices = @transform_2, window_bounds = array<i64: 16, 32>}, {transform_indices = @transform_3, window_bounds = array<i64: 8, 32, 32>}]} {
    %c0 = arith.constant 0 : index
    %c0_0 = arith.constant 0 : index
    %c0_1 = arith.constant 0 : index
    %0 = vector.load %arg1[%c0, %c0_0, %c0_1] : memref<8x16x16xf32, #tpu.memory_space<vmem>>, vector<8x16x16xf32>
    %c0_2 = arith.constant 0 : index
    %c0_3 = arith.constant 0 : index
    %c0_4 = arith.constant 0 : index
    %1 = vector.load %arg2[%c0_2, %c0_3, %c0_4] : memref<8x32x16xf32, #tpu.memory_space<vmem>>, vector<8x32x16xf32>
    "tpu.trace_start"() <{level = 10 : i32, message = "coh,chw->cow"}> : () -> ()
    %cst = arith.constant dense<0.000000e+00> : vector<8x32x16xf32>
    %2 = tpu.matmul %1, %0, %cst {dimension_numbers = #tpu.dot_dimension_numbers<[2], [1], [1], [2], [0, 0, 0, 1, 1, 2], [0], [0]>} : vector<8x32x16xf32>, vector<8x16x16xf32>, vector<8x32x16xf32> -> vector<8x32x16xf32>
    "tpu.trace_stop"() : () -> ()
    %3 = vector.shape_cast %2 : vector<8x32x16xf32> to vector<256x16xf32>
    %c0_5 = arith.constant 0 : index
    %c0_6 = arith.constant 0 : index
    %4 = vector.load %arg3[%c0_5, %c0_6] : memref<16x32xf32, #tpu.memory_space<vmem>>, vector<16x32xf32>
    %cst_7 = arith.constant dense<0.000000e+00> : vector<256x32xf32>
    %5 = tpu.matmul %3, %4, %cst_7 {dimension_numbers = #tpu.dot_dimension_numbers<[1], [0], [0], [1], [0, 0, 1, 1], [], []>} : vector<256x16xf32>, vector<16x32xf32>, vector<256x32xf32> -> vector<256x32xf32>
    %6 = vector.shape_cast %5 : vector<256x32xf32> to vector<8x32x32xf32>
    %c0_8 = arith.constant 0 : index
    %c0_9 = arith.constant 0 : index
    %c0_10 = arith.constant 0 : index
    %7 = vector.load %arg4[%c0_8, %c0_9, %c0_10] : memref<8x32x32xf32, #tpu.memory_space<vmem>>, vector<8x32x32xf32>
    tpu.vector_store %arg4[%c0_8, %c0_9, %c0_10], %6 {strides = array<i32>} : memref<8x32x32xf32, #tpu.memory_space<vmem>>, vector<8x32x32xf32>,
    return
  }
  func.func @transform_0(%arg0: i32) -> (i32, i32, i32) {
    %c0_i32 = arith.constant 0 : i32
    %c0_i32_0 = arith.constant 0 : i32
    %c0_i32_1 = arith.constant 0 : i32
    return %arg0, %c0_i32, %c0_i32_0 : i32, i32, i32
  }
  func.func @transform_1(%arg0: i32) -> (i32, i32, i32) {
    %c0_i32 = arith.constant 0 : i32
    %c0_i32_0 = arith.constant 0 : i32
    %c0_i32_1 = arith.constant 0 : i32
    %c0_i32_2 = arith.constant 0 : i32
    return %c0_i32, %c0_i32_0, %c0_i32_1 : i32, i32, i32
  }
  func.func @transform_2(%arg0: i32) -> (i32, i32) {
    %c0_i32 = arith.constant 0 : i32
    %c0_i32_0 = arith.constant 0 : i32
    %c0_i32_1 = arith.constant 0 : i32
    return %c0_i32, %c0_i32_0 : i32, i32
  }
  func.func @transform_3(%arg0: i32) -> (i32, i32, i32) {
    %c0_i32 = arith.constant 0 : i32
    %c0_i32_0 = arith.constant 0 : i32
    %c0_i32_1 = arith.constant 0 : i32
    return %arg0, %c0_i32, %c0_i32_0 : i32, i32, i32
  }
}

</mosaic_0001>

<bundles_post_ra>
// kernel: tpu_custom_call.1
= control target key start
LH: loop header
LB: loop body
LE: loop exit
PB: predicated region body
PF: predicated region fallthrough
CT: control target
= control target key end

     0   :  { %vm63_vm0 = vcmask 130048   ;;  %s1025_s0 = inlined_call_operand.vmem [shape: f32[8,16,16], index: 0, kind: input, shape index: {}]   ;;  %s1026_s1 = inlined_call_operand.vmem [shape: f32[8,32,16], index: 1, kind: input, shape index: {}]   ;;  %s1027_s2 = inlined_call_operand.vmem [shape: f32[16,32], index: 2, kind: input, shape index: {}]   ;;  %s1028_s3 = inlined_call_operand.hbm [shape: f32[8,32,32], index: 3, kind: output, shape index: {}]  }
   0x1   :  { %v20_v0 = vld [vmem:[%s1025_s0 + $0x28] sm:$0xff]  ;;  %v19_v1 = vld [vmem:[%s1025_s0 + $0x20] sm:$0xff]  ;;  %v22_v10 = vld [vmem:[%s1025_s0 + $0x38] sm:$0xff] }
   0x2   :  { %172 = vmatpush.msra.mxu2 %v20_v0  ;;  %v39_v2 = vld [vmem:[%s1026_s1 + $0x40] sm:$0xff]  ;;  %v16_v3 = vld [vmem:[%s1025_s0 + $0x8] sm:$0xff]  ;;  %v21_v11 = vld [vmem:[%s1025_s0 + $0x30] sm:$0xff]  ;;  %213 = vmatpush.msra.mxu3 %v22_v10 }
   0x3   :  { %v15_v4 = vld [vmem:[%s1025_s0] sm:$0xff]  ;;  %v28_v5 = vld [vmem:[%s1025_s0 + $0x68] sm:$0xff]  ;;  %90 = vmatpush.msra.mxu0 %v16_v3  ;;  %v30_v13 = vld [vmem:[%s1025_s0 + $0x78] sm:$0xff] }
   0x4   :  { %v31_v6 = vld [vmem:[%s1026_s1] sm:$0xff]  ;;  %173 = vmatpush.msra.mxu2 %v19_v1  ;;  %v24_v7 = vld [vmem:[%s1025_s0 + $0x48] sm:$0xff]  ;;  %v18_v14 = vld [vmem:[%s1025_s0 + $0x18] sm:$0xff]  ;;  %214 = vmatpush.msra.mxu3 %v21_v11 }
   0x5   :  { %662 = vmatmul.msk.f32.vlgmr.msra.gmra.mxu2 %vm63_vm0, %v39_v2  ;;  %91 = vmatpush.msra.mxu0 %v15_v4  ;;  %v27_v8 = vld [vmem:[%s1025_s0 + $0x60] sm:$0xff]  ;;  %v17_v15 = vld [vmem:[%s1025_s0 + $0x10] sm:$0xff]  ;;  %v40_v16 = vld [vmem:[%s1026_s1 + $0x48] sm:$0xff] }
   0x6   :  { %336 = vmatpush.msrb.mxu2 %v28_v5  ;;  %654 = vmatmul.msk.f32.vlgmr.msra.gmra.mxu0 %vm63_vm0, %v31_v6  ;;  %v23_v9 = vld [vmem:[%s1025_s0 + $0x40] sm:$0xff] }
   0x7   :  { %254 = vmatpush.msrb.mxu0 %v24_v7  ;;  %v43_v12 = vld [vmem:[%s1026_s1 + $0x60] sm:$0xff]  ;;  %131 = vmatpush.msra.mxu1 %v18_v14 }
   0x8   :  { %337 = vmatpush.msrb.mxu2 %v27_v8  ;;  %666 = vmatmul.msk.f32.vlgmr.msra.gmra.mxu3 %vm63_vm0, %v43_v12  ;;  %v35_v17 = vld [vmem:[%s1026_s1 + $0x20] sm:$0xff] }
   0x9   :  { %255 = vmatpush.msrb.mxu0 %v23_v9 }
   0xa   :  { %8 = vsyncpa [#allocation3], 0  ;;  %v32_v18 = vld [vmem:[%s1026_s1 + $0x8] sm:$0xff]  ;;  %377 = vmatpush.msrb.mxu3 %v30_v13  ;;  %v26_v19 = vld [vmem:[%s1025_s0 + $0x58] sm:$0xff]  ;;  %132 = vmatpush.msra.mxu1 %v17_v15  ;;  %vm603_vm1 = vcmask 261120   ;;  %s642_s4 = sshll.u32 %s1028_s3, 4  ;;  %s643_s4 = int_to_ptr.hbm [resolvable:$true] %s642_s4 }
   0xb   :  { %658 = vmatmul.msk.f32.vlgmr.msra.gmra.mxu1 %vm63_vm0, %v35_v17  ;;  %v44_v20 = vld [vmem:[%s1026_s1 + $0x68] sm:$0xff]  ;;  %v41_v21 = vld [vmem:[%s1026_s1 + $0x50] sm:$0xff]  ;;  %v42_v27 = vld [vmem:[%s1026_s1 + $0x58] sm:$0xff]  ;;  %s754_s5 = smov 128   ;;  %s755_s6 = smov 8  }
   0xc   :  { %295 = vmatpush.msrb.mxu1 %v26_v19  ;;  %v36_v22 = vld [vmem:[%s1026_s1 + $0x28] sm:$0xff]  ;;  %v33_v23 = vld [vmem:[%s1026_s1 + $0x10] sm:$0xff]  ;;  %v34_v29 = vld [vmem:[%s1026_s1 + $0x18] sm:$0xff] }
   0xd   :  { %663 = vmatmul.msk.f32.gmra.mxu2 %vm63_vm0, %v40_v16  ;;  %v29_v24 = vld [vmem:[%s1025_s0 + $0x70] sm:$0xff]  ;;  %v46_v30 = vld [vmem:[%s1026_s1 + $0x78] sm:$0xff]  ;;  %v55_v31 = vld [vmem:[%s1026_s1 + $0xc0] sm:$0xff] }
   0xe   :  { %655 = vmatmul.msk.f32.gmra.mxu0 %vm63_vm0, %v32_v18  ;;  %378 = vmatpush.msrb.mxu3 %v29_v24  ;;  %v25_v25 = vld [vmem:[%s1025_s0 + $0x50] sm:$0xff]  ;;  %v38_v32 = vld [vmem:[%s1026_s1 + $0x38] sm:$0xff]  ;;  %v47_v33 = vld [vmem:[%s1026_s1 + $0x80] sm:$0xff] }
   0xf   :  { %v45_v26 = vld [vmem:[%s1026_s1 + $0x70] sm:$0xff]  ;;  %296 = vmatpush.msrb.mxu1 %v25_v25  ;;  %v393_v34 = vld [vmem:[%s1027_s2 + $0x8] sm:$0xff]  ;;  %v59_v35 = vld [vmem:[%s1026_s1 + $0xe0] sm:$0xff] }
  0x10   :  { %667 = vmatmul.msk.f32.gmra.mxu3 %vm63_vm0, %v44_v20  ;;  %v37_v28 = vld [vmem:[%s1026_s1 + $0x30] sm:$0xff]  ;;  %504 = vmatpush.msra.mxu0 %v393_v34  ;;  %v56_v36 = vld [vmem:[%s1026_s1 + $0xc8] sm:$0xff]  ;;  %v51_v37 = vld [vmem:[%s1026_s1 + $0xa0] sm:$0xff] }
  0x11   :  { %718 = vmatpush.msra.mxu1 %v393_v34  ;;  %719 = vmatpush.msra.mxu2 %v393_v34  ;;  %v48_v38 = vld [vmem:[%s1026_s1 + $0x88] sm:$0xff]  ;;  %v57_v40 = vld [vmem:[%s1026_s1 + $0xd0] sm:$0xff]  ;;  %v58_v44 = vld [vmem:[%s1026_s1 + $0xd8] sm:$0xff] }
  0x12   :  { %720 = vmatpush.msra.mxu3 %v393_v34  ;;  %v60_v39 = vld [vmem:[%s1026_s1 + $0xe8] sm:$0xff]  ;;  %v49_v42 = vld [vmem:[%s1026_s1 + $0x90] sm:$0xff]  ;;  %v50_v46 = vld [vmem:[%s1026_s1 + $0x98] sm:$0xff] }
  0x13   :  { %659 = vmatmul.msk.f32.gmra.mxu1 %vm63_vm0, %v36_v22  ;;  %v52_v41 = vld [vmem:[%s1026_s1 + $0xa8] sm:$0xff]  ;;  %v61_v43 = vld [vmem:[%s1026_s1 + $0xf0] sm:$0xff]  ;;  %v62_v47 = vld [vmem:[%s1026_s1 + $0xf8] sm:$0xff] }
  0x14   :  { %v53_v45 = vld [vmem:[%s1026_s1 + $0xb0] sm:$0xff]  ;;  %v54_v48 = vld [vmem:[%s1026_s1 + $0xb8] sm:$0xff]  ;;  %v392_v49 = vld [vmem:[%s1027_s2] sm:$0xff]  ;;  %s753_s1 = smov [#allocation2]  }
  0x15   :  { %664 = vmatmul.msk.f32.gmra.mxu2 %vm63_vm0, %v41_v21  ;;  %505 = vmatpush.msra.mxu0 %v392_v49  ;;  %s640_s2 = sshll.u32 %s753_s1, 4  ;;  %s641_s2 = int_to_ptr.vmem [resolvable:$true] %s640_s2 }
  0x16   :  { %656 = vmatmul.msk.f32.gmra.mxu0 %vm63_vm0, %v33_v23  ;;  %721 = vmatpush.msra.mxu1 %v392_v49 }
  0x17   :  { %722 = vmatpush.msra.mxu2 %v392_v49  ;;  %723 = vmatpush.msra.mxu3 %v392_v49 }
  0x18   :  { %668 = vmatmul.msk.f32.gmra.mxu3 %vm63_vm0, %v45_v26 }
  0x1b   :  { %660 = vmatmul.msk.f32.gmra.mxu1 %vm63_vm0, %v37_v28 }
  0x1d   :  { %665 = vmatmul.msk.f32.gmra.mxu2 %vm63_vm0, %v42_v27 }
  0x1e   :  { %657 = vmatmul.msk.f32.gmra.mxu0 %vm63_vm0, %v34_v29 }
  0x20   :  { %669 = vmatmul.msk.f32.gmra.mxu3 %vm63_vm0, %v46_v30 }
  0x23   :  { %661 = vmatmul.msk.f32.gmra.mxu1 %vm63_vm0, %v38_v32 }
  0x25   :  { %678 = vmatmul.msk.f32.vlgmr.msrb.gmra.mxu2 %vm63_vm0, %v55_v31 }
  0x26   :  { %670 = vmatmul.msk.f32.vlgmr.msrb.gmra.mxu0 %vm63_vm0, %v47_v33 }
  0x28   :  { %682 = vmatmul.msk.f32.vlgmr.msrb.gmra.mxu3 %vm63_vm0, %v59_v35 }
  0x2b   :  { %674 = vmatmul.msk.f32.vlgmr.msrb.gmra.mxu1 %vm63_vm0, %v51_v37 }
  0x2d   :  { %679 = vmatmul.msk.f32.gmra.mxu2 %vm63_vm0, %v56_v36 }
  0x2e   :  { %671 = vmatmul.msk.f32.gmra.mxu0 %vm63_vm0, %v48_v38 }
  0x30   :  { %683 = vmatmul.msk.f32.gmra.mxu3 %vm63_vm0, %v60_v39 }
  0x33   :  { %675 = vmatmul.msk.f32.gmra.mxu1 %vm63_vm0, %v52_v41 }
  0x35   :  { %680 = vmatmul.msk.f32.gmra.mxu2 %vm63_vm0, %v57_v40 }
  0x36   :  { %672 = vmatmul.msk.f32.gmra.mxu0 %vm63_vm0, %v49_v42 }
  0x38   :  { %684 = vmatmul.msk.f32.gmra.mxu3 %vm63_vm0, %v61_v43 }
  0x3b   :  { %676 = vmatmul.msk.f32.gmra.mxu1 %vm63_vm0, %v53_v45 }
  0x3d   :  { %681 = vmatmul.msk.f32.gmra.mxu2 %vm63_vm0, %v58_v44 }
  0x3e   :  { %673 = vmatmul.msk.f32.gmra.mxu0 %vm63_vm0, %v50_v46 }
  0x40   :  { %685 = vmatmul.msk.f32.gmra.mxu3 %vm63_vm0, %v62_v47 }
  0x43   :  { %677 = vmatmul.msk.f32.gmra.mxu1 %vm63_vm0, %v54_v48 }
  0x83   :  { %v93_v50 = vpop.f32.mrf.mxu0 }
  0x84   :  { %686 = vmatmul.msk.f32.vlgmr.msra.gmra.mxu0 %vm63_vm0, %v93_v50 }
  0x88   :  { %v175_v51 = vpop.f32.mrf.mxu2  ;;  %v134_v55 = vpop.f32.mrf.mxu1 }
  0x89   :  { %694 = vmatmul.msk.f32.vlgmr.msra.gmra.mxu1 %vm63_vm0, %v175_v51 }
  0x8b   :  { %v96_v52 = vpop.f32.mrf.mxu0  ;;  %v216_v57 = vpop.f32.mrf.mxu3 }
  0x8c   :  { %687 = vmatmul.msk.f32.gmra.mxu0 %vm63_vm0, %v96_v52 }
  0x90   :  { %v178_v53 = vpop.f32.mrf.mxu2  ;;  %v137_v59 = vpop.f32.mrf.mxu1 }
  0x91   :  { %695 = vmatmul.msk.f32.gmra.mxu1 %vm63_vm0, %v178_v53 }
  0x93   :  { %v99_v54 = vpop.f32.mrf.mxu0  ;;  %v219_v61 = vpop.f32.mrf.mxu3 }
  0x94   :  { %688 = vmatmul.msk.f32.gmra.mxu0 %vm63_vm0, %v99_v54 }
  0x98   :  { %v181_v56 = vpop.f32.mrf.mxu2  ;;  %v140_v63 = vpop.f32.mrf.mxu1 }
  0x99   :  { %696 = vmatmul.msk.f32.gmra.mxu1 %vm63_vm0, %v181_v56 }
  0x9b   :  { %v102_v58 = vpop.f32.mrf.mxu0  ;;  %v222_v2 = vpop.f32.mrf.mxu3 }
  0x9c   :  { %689 = vmatmul.msk.f32.gmra.mxu0 %vm63_vm0, %v102_v58 }
  0xa0   :  { %v184_v60 = vpop.f32.mrf.mxu2  ;;  %v143_v4 = vpop.f32.mrf.mxu1 }
  0xa1   :  { %697 = vmatmul.msk.f32.gmra.mxu1 %vm63_vm0, %v184_v60 }
  0xa3   :  { %v257_v62 = vpop.f32.mrf.mxu0  ;;  %v225_v6 = vpop.f32.mrf.mxu3 }
  0xa4   :  { %690 = vmatmul.msk.f32.gmra.mxu0 %vm63_vm0, %v134_v55  ;;  %702 = vmatmul.msk.f32.vlgmr.msra.gmra.mxu2 %vm63_vm0, %v257_v62 }
  0xa8   :  { %v339_v0 = vpop.f32.mrf.mxu2  ;;  %v298_v9 = vpop.f32.mrf.mxu1 }
  0xa9   :  { %698 = vmatmul.msk.f32.gmra.mxu1 %vm63_vm0, %v216_v57  ;;  %710 = vmatmul.msk.f32.vlgmr.msra.gmra.mxu3 %vm63_vm0, %v339_v0 }
  0xab   :  { %v260_v1 = vpop.f32.mrf.mxu0  ;;  %v380_v11 = vpop.f32.mrf.mxu3 }
  0xac   :  { %691 = vmatmul.msk.f32.gmra.mxu0 %vm63_vm0, %v137_v59  ;;  %703 = vmatmul.msk.f32.gmra.mxu2 %vm63_vm0, %v260_v1 }
  0xb0   :  { %v342_v3 = vpop.f32.mrf.mxu2  ;;  %v301_v12 = vpop.f32.mrf.mxu1 }
  0xb1   :  { %699 = vmatmul.msk.f32.gmra.mxu1 %vm63_vm0, %v219_v61  ;;  %711 = vmatmul.msk.f32.gmra.mxu3 %vm63_vm0, %v342_v3 }
  0xb3   :  { %v263_v5 = vpop.f32.mrf.mxu0  ;;  %v383_v13 = vpop.f32.mrf.mxu3 }
  0xb4   :  { %692 = vmatmul.msk.f32.gmra.mxu0 %vm63_vm0, %v140_v63  ;;  %704 = vmatmul.msk.f32.gmra.mxu2 %vm63_vm0, %v263_v5 }
  0xb8   :  { %v345_v7 = vpop.f32.mrf.mxu2  ;;  %v304_v14 = vpop.f32.mrf.mxu1 }
  0xb9   :  { %700 = vmatmul.msk.f32.gmra.mxu1 %vm63_vm0, %v222_v2  ;;  %712 = vmatmul.msk.f32.gmra.mxu3 %vm63_vm0, %v345_v7 }
  0xbb   :  { %v266_v8 = vpop.f32.mrf.mxu0  ;;  %v386_v15 = vpop.f32.mrf.mxu3 }
  0xbc   :  { %693 = vmatmul.msk.f32.gmra.mxu0 %vm63_vm0, %v143_v4  ;;  %705 = vmatmul.msk.f32.gmra.mxu2 %vm63_vm0, %v266_v8 }
  0xc0   :  { %v348_v10 = vpop.f32.mrf.mxu2  ;;  %v307_v16 = vpop.f32.mrf.mxu1 }
  0xc1   :  { %701 = vmatmul.msk.f32.gmra.mxu1 %vm63_vm0, %v225_v6  ;;  %713 = vmatmul.msk.f32.gmra.mxu3 %vm63_vm0, %v348_v10 }
  0xc3   :  { %v389_v17 = vpop.f32.mrf.mxu3 }
  0xc4   :  { %706 = vmatmul.msk.f32.gmra.mxu2 %vm63_vm0, %v298_v9 }
  0xc9   :  { %714 = vmatmul.msk.f32.gmra.mxu3 %vm63_vm0, %v380_v11 }
  0xcc   :  { %707 = vmatmul.msk.f32.gmra.mxu2 %vm63_vm0, %v301_v12 }
  0xd1   :  { %715 = vmatmul.msk.f32.gmra.mxu3 %vm63_vm0, %v383_v13 }
  0xd4   :  { %708 = vmatmul.msk.f32.gmra.mxu2 %vm63_vm0, %v304_v14 }
  0xd9   :  { %716 = vmatmul.msk.f32.gmra.mxu3 %vm63_vm0, %v386_v15 }
  0xdc   :  { %709 = vmatmul.msk.f32.gmra.mxu2 %vm63_vm0, %v307_v16 }
  0xe1   :  { %717 = vmatmul.msk.f32.gmra.mxu3 %vm63_vm0, %v389_v17 }
 0x101   :  { %v507_v18 = vpop.f32.mrf.mxu0 }
 0x102   :  { %604 = vst.msk [vmem:[#allocation2] sm:$0xff] %vm603_vm1, %v507_v18 }
 0x106   :  { %v531_v19 = vpop.f32.mrf.mxu1 }
 0x107   :  { %612 = vst.msk [vmem:[#allocation2 + $0x40] sm:$0xff] %vm603_vm1, %v531_v19 }
 0x109   :  { %v510_v20 = vpop.f32.mrf.mxu0 }
 0x10a   :  { %605 = vst.msk [vmem:[#allocation2 + $0x8] sm:$0xff] %vm603_vm1, %v510_v20 }
 0x10e   :  { %v534_v21 = vpop.f32.mrf.mxu1 }
 0x10f   :  { %613 = vst.msk [vmem:[#allocation2 + $0x48] sm:$0xff] %vm603_vm1, %v534_v21 }
 0x111   :  { %v513_v22 = vpop.f32.mrf.mxu0 }
 0x112   :  { %606 = vst.msk [vmem:[#allocation2 + $0x10] sm:$0xff] %vm603_vm1, %v513_v22 }
 0x116   :  { %v537_v23 = vpop.f32.mrf.mxu1 }
 0x117   :  { %614 = vst.msk [vmem:[#allocation2 + $0x50] sm:$0xff] %vm603_vm1, %v537_v23 }
 0x119   :  { %v516_v24 = vpop.f32.mrf.mxu0 }
 0x11a   :  { %607 = vst.msk [vmem:[#allocation2 + $0x18] sm:$0xff] %vm603_vm1, %v516_v24 }
 0x11e   :  { %v540_v25 = vpop.f32.mrf.mxu1 }
 0x11f   :  { %615 = vst.msk [vmem:[#allocation2 + $0x58] sm:$0xff] %vm603_vm1, %v540_v25 }
 0x121   :  { %v519_v26 = vpop.f32.mrf.mxu0 }
 0x122   :  { %608 = vst.msk [vmem:[#allocation2 + $0x20] sm:$0xff] %vm603_vm1, %v519_v26 }
 0x126   :  { %v543_v27 = vpop.f32.mrf.mxu1 }
 0x127   :  { %616 = vst.msk [vmem:[#allocation2 + $0x60] sm:$0xff] %vm603_vm1, %v543_v27  ;;  %v555_v28 = vpop.f32.mrf.mxu2 }
 0x128   :  { %620 = vst.msk [vmem:[#allocation2 + $0x80] sm:$0xff] %vm603_vm1, %v555_v28 }
 0x129   :  { %v522_v29 = vpop.f32.mrf.mxu0 }
 0x12a   :  { %609 = vst.msk [vmem:[#allocation2 + $0x28] sm:$0xff] %vm603_vm1, %v522_v29 }
 0x12c   :  { %v579_v30 = vpop.f32.mrf.mxu3 }
 0x12d   :  { %628 = vst.msk [vmem:[#allocation2 + $0xc0] sm:$0xff] %vm603_vm1, %v579_v30 }
 0x12e   :  { %v546_v31 = vpop.f32.mrf.mxu1 }
 0x12f   :  { %617 = vst.msk [vmem:[#allocation2 + $0x68] sm:$0xff] %vm603_vm1, %v546_v31  ;;  %v558_v32 = vpop.f32.mrf.mxu2 }
 0x130   :  { %621 = vst.msk [vmem:[#allocation2 + $0x88] sm:$0xff] %vm603_vm1, %v558_v32 }
 0x131   :  { %v525_v33 = vpop.f32.mrf.mxu0 }
 0x132   :  { %610 = vst.msk [vmem:[#allocation2 + $0x30] sm:$0xff] %vm603_vm1, %v525_v33 }
 0x134   :  { %v582_v34 = vpop.f32.mrf.mxu3 }
 0x135   :  { %629 = vst.msk [vmem:[#allocation2 + $0xc8] sm:$0xff] %vm603_vm1, %v582_v34 }
 0x136   :  { %v549_v35 = vpop.f32.mrf.mxu1 }
 0x137   :  { %618 = vst.msk [vmem:[#allocation2 + $0x70] sm:$0xff] %vm603_vm1, %v549_v35  ;;  %v561_v36 = vpop.f32.mrf.mxu2 }
 0x138   :  { %622 = vst.msk [vmem:[#allocation2 + $0x90] sm:$0xff] %vm603_vm1, %v561_v36 }
 0x139   :  { %v528_v37 = vpop.f32.mrf.mxu0 }
 0x13a   :  { %611 = vst.msk [vmem:[#allocation2 + $0x38] sm:$0xff] %vm603_vm1, %v528_v37 }
 0x13c   :  { %v585_v38 = vpop.f32.mrf.mxu3 }
 0x13d   :  { %630 = vst.msk [vmem:[#allocation2 + $0xd0] sm:$0xff] %vm603_vm1, %v585_v38 }
 0x13e   :  { %v552_v39 = vpop.f32.mrf.mxu1 }
 0x13f   :  { %619 = vst.msk [vmem:[#allocation2 + $0x78] sm:$0xff] %vm603_vm1, %v552_v39  ;;  %v564_v40 = vpop.f32.mrf.mxu2 }
 0x140   :  { %623 = vst.msk [vmem:[#allocation2 + $0x98] sm:$0xff] %vm603_vm1, %v564_v40 }
 0x144   :  { %v588_v41 = vpop.f32.mrf.mxu3 }
 0x145   :  { %631 = vst.msk [vmem:[#allocation2 + $0xd8] sm:$0xff] %vm603_vm1, %v588_v41 }
 0x147   :  { %v567_v42 = vpop.f32.mrf.mxu2 }
 0x148   :  { %624 = vst.msk [vmem:[#allocation2 + $0xa0] sm:$0xff] %vm603_vm1, %v567_v42 }
 0x14c   :  { %v591_v43 = vpop.f32.mrf.mxu3 }
 0x14d   :  { %632 = vst.msk [vmem:[#allocation2 + $0xe0] sm:$0xff] %vm603_vm1, %v591_v43 }
 0x14f   :  { %v570_v44 = vpop.f32.mrf.mxu2 }
 0x150   :  { %625 = vst.msk [vmem:[#allocation2 + $0xa8] sm:$0xff] %vm603_vm1, %v570_v44 }
 0x154   :  { %v594_v45 = vpop.f32.mrf.mxu3 }
 0x155   :  { %633 = vst.msk [vmem:[#allocation2 + $0xe8] sm:$0xff] %vm603_vm1, %v594_v45 }
 0x157   :  { %v573_v46 = vpop.f32.mrf.mxu2 }
 0x158   :  { %626 = vst.msk [vmem:[#allocation2 + $0xb0] sm:$0xff] %vm603_vm1, %v573_v46 }
 0x15c   :  { %v597_v47 = vpop.f32.mrf.mxu3 }
 0x15d   :  { %634 = vst.msk [vmem:[#allocation2 + $0xf0] sm:$0xff] %vm603_vm1, %v597_v47 }
 0x15f   :  { %v576_v48 = vpop.f32.mrf.mxu2 }
 0x160   :  { %627 = vst.msk [vmem:[#allocation2 + $0xb8] sm:$0xff] %vm603_vm1, %v576_v48 }
 0x164   :  { %v600_v49 = vpop.f32.mrf.mxu3 }
 0x165   :  { %635 = vst.msk [vmem:[#allocation2 + $0xf8] sm:$0xff] %vm603_vm1, %v600_v49 }
 0x166   :  { %648 = dma.vmem_to_hbm [thread:$0]  %s641_s2, 4096, %s643_s4, [#allocation3], %s754_s5, %s754_s5, %s755_s6  }
 0x167   :  { %751 = dma.done.wait [#allocation3], 4096  }
 0x168   :  { %752 = vsyncadd [#allocation3], 4294963200 }
 0x169   :  { %653 = vsyncpa [#allocation3], 1 }

</bundles_post_ra>
